<compile_context>
chip_gen: v7x
topology: tpu7x:2x2x1
jax: 0.10.0
libtpu: 0.0.40
codegen_flags: <defaults>
</compile_context>

<pallas_src>
import functools

import numpy as np
import jax
import jax.numpy as jnp
from jax.experimental import pallas as pl
from jax.experimental.pallas import tpu as pltpu


def _softplus(z):
    # numerically stable softplus; BCEWithLogits(z, t) == softplus(z) - z * t
    return jnp.maximum(z, 0.0) + jnp.log1p(jnp.exp(-jnp.abs(z)))


# ---------------------------------------------------------------------------
# Fused loss kernel: one pass over the lane-dense negative slab + one pass
# over the padded positive slab.  All per-step data arrives as inputs.
# ---------------------------------------------------------------------------
def _loss_kernel(zneg_ref, wneg_ref, ypos_ref, tpos_ref, wbce_ref, whub_ref,
                 out_ref, *, lamb):
    # ---- negatives: weighted softplus over the (N,128) slab ---------------
    zn = zneg_ref[...]
    wn = wneg_ref[...]
    zn = jnp.where(wn > 0.0, zn, 0.0)          # guard 0*inf / 0*NaN
    loss_neg = jnp.sum(_softplus(zn) * wn)     # == sum_j mean(BCE(z_j, 0))

    # ---- positives: obj BCE(.,1) + cls BCE + SmoothL1 bbox -----------------
    y = ypos_ref[...]                          # (Pmax, 128) predictions (0-padded)
    t = tpos_ref[...]                          # (Pmax, 128) targets     (0-padded)
    wb = wbce_ref[...]                         # col 4 -> 1, cols 5..5+nc -> 1/nc
    wh = whub_ref[...]                         # cols 0..3 -> 0.25 (mean of 4)

    bce = _softplus(y) - y * t                 # elementwise BCE-with-logits
    loss_pos_obj = jnp.sum(jnp.where(wb > 0.0, bce, 0.0) * wb)

    d = y - t
    ad = jnp.abs(d)
    hub = jnp.where(ad < 1.0, 0.5 * d * d, ad - 0.5)   # SmoothL1, beta = 1
    loss_bbx = jnp.sum(jnp.where(wh > 0.0, hub, 0.0) * wh)

    loss_obj = loss_neg + loss_pos_obj
    out_ref[0] = loss_obj
    out_ref[1] = loss_bbx
    out_ref[2] = loss_obj + lamb * loss_bbx
    out_ref[3] = loss_neg


# ---------------------------------------------------------------------------
# Jitted device function: prep (slice / pack / gather) fused with the kernel.
# All per-step variation enters via array arguments -> traced & compiled once.
# ---------------------------------------------------------------------------
@functools.partial(jax.jit, static_argnums=(8, 9, 10))
def _device_loss(x, wneg, tpos, wbce, whub, scale_arr, base_arr, sp_arr,
                 grid_sizes, num_classes, lamb):
    nrows = wneg.shape[0]
    pmax = tpos.shape[0]
    width = num_classes + 5

    # ---- negatives: one lane-dense (N, 128) logit slab ---------------------
    parts = []
    for j, gs in enumerate(grid_sizes):
        # channels {4, 4+nc, 4+2nc} == objectness logits of anchors 0..2
        plane = x[j][0, 4:4 + 3 * num_classes:num_classes, :, :]   # (3, gs, gs)
        parts.append(plane.reshape(-1).astype(jnp.float32))        # (anc, yy, xx)
    flat = jnp.concatenate(parts)
    flat = jnp.pad(flat, (0, nrows * 128 - flat.shape[0]))
    zneg = flat.reshape(nrows, 128)

    # ---- positives: index-driven gather into a (Pmax, 128) slab ------------
    ch = base_arr[:, None] + jnp.arange(width, dtype=jnp.int32)    # (Pmax, width)
    acc = jnp.zeros((pmax, width), jnp.float32)
    for s, gs in enumerate(grid_sizes):
        xs = x[s][0].astype(jnp.float32).reshape(x[s].shape[1], gs * gs)
        sp = jnp.clip(sp_arr, 0, gs * gs - 1)
        g = xs[ch, sp[:, None]]                                    # (Pmax, width)
        acc = jnp.where((scale_arr == s)[:, None], g, acc)
    ypos = jnp.pad(acc, ((0, 0), (0, 128 - width)))                # explicit 0 fill

    kernel = functools.partial(_loss_kernel, lamb=float(lamb))
    out = pl.pallas_call(
        kernel,
        out_shape=jax.ShapeDtypeStruct((4,), jnp.float32),
        in_specs=[pl.BlockSpec(memory_space=pltpu.MemorySpace.VMEM)] * 6,
        out_specs=pl.BlockSpec(memory_space=pltpu.MemorySpace.SMEM),
    )(zneg, wneg, ypos, tpos, wbce, whub)
    return out


# ---------------------------------------------------------------------------
# YoloLoss.forward equivalent (host wrapper: pure numpy prep of weights /
# targets / index tables, then one jitted device call).
# ---------------------------------------------------------------------------
def yolo_loss(x, label, pos, neg, anchors, grid_sizes, inp_dim=416,
              num_classes=80, lamb=1.0):
    grid_sizes = tuple(int(g) for g in grid_sizes)
    label_cls, label_bbx = label
    nc = int(num_classes)
    width = nc + 5
    assert width <= 128, "num_classes + 5 must fit in 128 lanes"

    # ---- negative weight slab (keep/count folded in), pure numpy -----------
    t_elems = sum(3 * g * g for g in grid_sizes)
    nrows = -(-t_elems // 128)
    wparts = []
    for j, g in enumerate(grid_sizes):
        keep = ~np.asarray(neg[j], dtype=bool)                 # "if not n" -> negatives
        cnt = int(keep.sum())
        # flat neg index i <-> (yy, xx, anc); permute to (anc, yy, xx) order
        w = keep.reshape(g, g, 3).transpose(2, 0, 1).astype(np.float32)
        w *= (1.0 / cnt) if cnt > 0 else 0.0                   # empty scale -> 0 contribution
        wparts.append(w.reshape(-1))
    wneg = np.zeros((nrows * 128,), np.float32)
    cat = np.concatenate(wparts)
    wneg[:cat.size] = cat
    wneg = wneg.reshape(nrows, 128)

    # ---- positive target / weight slabs + index arrays, pure numpy ---------
    P = len(pos)
    pmax = max(8, ((P + 7) // 8) * 8)     # fixed 8 for the common case -> stable shapes
    tpos = np.zeros((pmax, 128), np.float32)
    wbce = np.zeros((pmax, 128), np.float32)
    whub = np.zeros((pmax, 128), np.float32)
    scale_arr = np.zeros((pmax,), np.int32)
    base_arr = np.zeros((pmax,), np.int32)
    sp_arr = np.zeros((pmax,), np.int32)
    for j, ps in enumerate(pos):
        i, anc_idx, _, x_idx, y_idx = ps
        stride = inp_dim // grid_sizes[j]     # mirrors the reference's indexing (by pos position)
        anc = anchors[j][i]                   # mirrors the reference's indexing
        scale_arr[j] = i
        base_arr[j] = anc_idx * nc
        sp_arr[j] = y_idx * grid_sizes[i] + x_idx
        tb = np.asarray(label_bbx[j], np.float32)
        x_c = (tb[0] + tb[2]) / 2.0
        y_c = (tb[1] + tb[3]) / 2.0
        w_ = tb[2] - tb[0]
        h_ = tb[3] - tb[1]
        tpos[j, 0] = (x_c - x_idx * stride) / anc[0]
        tpos[j, 1] = (y_c - y_idx * stride) / anc[1]
        tpos[j, 2] = np.log(w_ / anc[0])
        tpos[j, 3] = np.log(h_ / anc[1])
        tpos[j, 4] = 1.0
        tpos[j, 5 + int(label_cls[j])] = 1.0
        wbce[j, 4] = 1.0                       # obj BCE (mean of 1)
        wbce[j, 5:5 + nc] = 1.0 / nc           # cls BCE mean
        whub[j, 0:4] = 0.25                    # SmoothL1 mean of 4

    out = _device_loss(tuple(x), jnp.asarray(wneg), jnp.asarray(tpos),
                       jnp.asarray(wbce), jnp.asarray(whub),
                       jnp.asarray(scale_arr), jnp.asarray(base_arr),
                       jnp.asarray(sp_arr), grid_sizes, nc, float(lamb))
    # TODO(synk): the original module print()s intermediate losses; out[0]
    # (loss_obj), out[1] (loss_bbx) and out[3] (negative-only part) are exposed
    # for logging instead of re-deriving them.
    return out[2]


# ---------------------------------------------------------------------------
# pure-numpy reference (mirrors the PyTorch code) for a sanity check
# ---------------------------------------------------------------------------
def ref_loss(x_np, label, pos, neg, anchors, grid_sizes, inp_dim, num_classes, lamb):
    label_cls, label_bbx = label

    def softplus(z):
        return np.maximum(z, 0.0) + np.log1p(np.exp(-np.abs(z)))

    loss_obj = 0.0
    loss_bbx = 0.0
    for j, ng in enumerate(neg):
        ng = np.asarray(ng, bool)
        gs = grid_sizes[j]
        rows = [[i % (gs * 3) % 3, i // (gs * 3), i % (gs * 3) // 3]
                for i, n in enumerate(ng) if not n]
        if len(rows) == 0:
            continue
        rows = np.asarray(rows, np.int64)
        y_ = x_np[j][0, rows[:, 0] * num_classes + 4, rows[:, 1], rows[:, 2]]
        loss_obj += softplus(y_).mean()
    for j, ps in enumerate(pos):
        i, anc_idx, _, x_idx, y_idx = ps
        stride = inp_dim // grid_sizes[j]
        anc = anchors[j][i]
        base = anc_idx * num_classes
        y_obj = x_np[i][0, base + 4, y_idx, x_idx]
        loss_obj += softplus(-y_obj)
        y_cls = x_np[i][0, base + 5: base + 5 + num_classes, y_idx, x_idx]
        t_cls = np.zeros_like(y_cls)
        t_cls[label_cls[j]] = 1.0
        loss_obj += (softplus(y_cls) - y_cls * t_cls).mean()
        y_bbx = x_np[i][0, base: base + 4, y_idx, x_idx]
        tb = np.asarray(label_bbx[j], np.float32)
        x_c = (tb[0] + tb[2]) / 2.0
        y_c = (tb[1] + tb[3]) / 2.0
        w = tb[2] - tb[0]
        h = tb[3] - tb[1]
        t = np.array([(x_c - x_idx * stride) / anc[0],
                      (y_c - y_idx * stride) / anc[1],
                      np.log(w / anc[0]),
                      np.log(h / anc[1])], np.float32)
        d = y_bbx - t
        ad = np.abs(d)
        loss_bbx += np.where(ad < 1.0, 0.5 * d * d, ad - 0.5).mean()
    return loss_obj + lamb * loss_bbx


if __name__ == "__main__":
    key = jax.random.PRNGKey(0)
    grid_sizes = [8, 4]           # small grids (module default is [13,26,52])
    inp_dim = 32
    num_classes = 80              # class-slice width is hard-coded to 80 in the module
    C = 255                       # 3 * (5 + 80) channels per YOLO head
    lamb = 1.0

    k1, k2, k3, k4 = jax.random.split(key, 4)
    x = [jax.random.normal(k1, (1, C, grid_sizes[0], grid_sizes[0]), jnp.float32),
         jax.random.normal(k2, (1, C, grid_sizes[1], grid_sizes[1]), jnp.float32)]

    neg = [np.asarray(jax.random.bernoulli(k3, 0.5, (3 * grid_sizes[0] ** 2,))),
           np.asarray(jax.random.bernoulli(k4, 0.5, (3 * grid_sizes[1] ** 2,)))]

    anchors = [[(10.0, 13.0), (16.0, 30.0), (33.0, 23.0)],
               [(30.0, 61.0), (62.0, 45.0), (59.0, 119.0)]]
    # each positive: (scale_idx, anc_idx, unused, x_idx, y_idx)
    pos = [(0, 2, None, 5, 3), (1, 0, None, 2, 1)]
    label_cls = [7, 42]
    label_bbx = [np.array([3.0, 5.0, 20.0, 18.0], np.float32),
                 np.array([8.0, 4.0, 30.0, 28.0], np.float32)]

    out = yolo_loss(x, (label_cls, label_bbx), pos, neg, anchors,
                    grid_sizes, inp_dim, num_classes, lamb)
    out = jax.block_until_ready(out)

    x_np = [np.asarray(v) for v in x]
    ref = ref_loss(x_np, (label_cls, label_bbx), pos, neg, anchors,
                   grid_sizes, inp_dim, num_classes, lamb)
    assert np.allclose(float(out), float(ref), rtol=1e-3, atol=1e-3), (float(out), float(ref))

    # Second step with different pos/neg (same static config): exercises the
    # stable kernel signature (no retrace / no Mosaic recompile) and checks
    # correctness again.
    k5, k6 = jax.random.split(k4)
    neg2 = [np.asarray(jax.random.bernoulli(k5, 0.3, (3 * grid_sizes[0] ** 2,))),
            np.asarray(jax.random.bernoulli(k6, 0.7, (3 * grid_sizes[1] ** 2,)))]
    pos2 = [(1, 1, None, 1, 2)]
    label_cls2 = [3]
    label_bbx2 = [np.array([2.0, 2.0, 12.0, 16.0], np.float32)]
    out2 = yolo_loss(x, (label_cls2, label_bbx2), pos2, neg2, anchors,
                     grid_sizes, inp_dim, num_classes, lamb)
    out2 = jax.block_until_ready(out2)
    ref2 = ref_loss(x_np, (label_cls2, label_bbx2), pos2, neg2, anchors,
                    grid_sizes, inp_dim, num_classes, lamb)
    assert np.allclose(float(out2), float(ref2), rtol=1e-3, atol=1e-3), (float(out2), float(ref2))

    print("KERNEL_OK")
</pallas_src>

<mosaic_0001>
module attributes {stable_mosaic.version = 11 : i64} {
  func.func @_loss_kernel(%arg0: memref<2x128xf32, #tpu.memory_space<vmem>>, %arg1: memref<2x128xf32, #tpu.memory_space<vmem>>, %arg2: memref<8x128xf32, #tpu.memory_space<vmem>>, %arg3: memref<8x128xf32, #tpu.memory_space<vmem>>, %arg4: memref<8x128xf32, #tpu.memory_space<vmem>>, %arg5: memref<8x128xf32, #tpu.memory_space<vmem>>, %arg6: memref<4xf32, #tpu.memory_space<smem>>) attributes {dimension_semantics = [], scalar_prefetch = 0 : i64, scratch_operands = 0 : i64, tpu.core_type = #tpu.core_type<tc>} {
    %c0 = arith.constant 0 : index
    %c0_0 = arith.constant 0 : index
    %0 = vector.load %arg0[%c0, %c0_0] : memref<2x128xf32, #tpu.memory_space<vmem>>, vector<2x128xf32>
    %c0_1 = arith.constant 0 : index
    %c0_2 = arith.constant 0 : index
    %1 = vector.load %arg1[%c0_1, %c0_2] : memref<2x128xf32, #tpu.memory_space<vmem>>, vector<2x128xf32>
    %cst = arith.constant 0.000000e+00 : f32
    %2 = vector.broadcast %cst : f32 to vector<2x128xf32>
    %3 = arith.cmpf ogt, %1, %2 : vector<2x128xf32>
    %cst_3 = arith.constant 0.000000e+00 : f32
    %4 = vector.broadcast %cst_3 : f32 to vector<2x128xf32>
    %5 = arith.select %3, %0, %4 : vector<2x128xi1>, vector<2x128xf32>
    %cst_4 = arith.constant 0.000000e+00 : f32
    %6 = vector.broadcast %cst_4 : f32 to vector<2x128xf32>
    %7 = arith.maximumf %5, %6 : vector<2x128xf32>
    %8 = math.absf %5 : vector<2x128xf32>
    %cst_5 = arith.constant 0.000000e+00 : f32
    %9 = vector.broadcast %cst_5 : f32 to vector<2x128xf32>
    %10 = arith.subf %9, %8 : vector<2x128xf32>
    %11 = math.exp %10 : vector<2x128xf32>
    %12 = math.log1p %11 : vector<2x128xf32>
    %13 = arith.addf %7, %12 : vector<2x128xf32>
    %14 = arith.mulf %13, %1 : vector<2x128xf32>
    %15 = vector.shape_cast %14 : vector<2x128xf32> to vector<1x2x128xf32>
    %cst_6 = arith.constant dense<0.000000e+00> : vector<1xf32>
    %16 = vector.multi_reduction <add>, %15, %cst_6 [1, 2] : vector<1x2x128xf32> to vector<1xf32>
    %17 = vector.shape_cast %16 : vector<1xf32> to vector<1x1x1xf32>
    %18 = vector.extract %17[0, 0, 0] : f32 from vector<1x1x1xf32>
    %c0_7 = arith.constant 0 : index
    %c0_8 = arith.constant 0 : index
    %19 = vector.load %arg2[%c0_7, %c0_8] : memref<8x128xf32, #tpu.memory_space<vmem>>, vector<8x128xf32>
    %c0_9 = arith.constant 0 : index
    %c0_10 = arith.constant 0 : index
    %20 = vector.load %arg3[%c0_9, %c0_10] : memref<8x128xf32, #tpu.memory_space<vmem>>, vector<8x128xf32>
    %c0_11 = arith.constant 0 : index
    %c0_12 = arith.constant 0 : index
    %21 = vector.load %arg4[%c0_11, %c0_12] : memref<8x128xf32, #tpu.memory_space<vmem>>, vector<8x128xf32>
    %c0_13 = arith.constant 0 : index
    %c0_14 = arith.constant 0 : index
    %22 = vector.load %arg5[%c0_13, %c0_14] : memref<8x128xf32, #tpu.memory_space<vmem>>, vector<8x128xf32>
    %cst_15 = arith.constant 0.000000e+00 : f32
    %23 = vector.broadcast %cst_15 : f32 to vector<8x128xf32>
    %24 = arith.maximumf %19, %23 : vector<8x128xf32>
    %25 = math.absf %19 : vector<8x128xf32>
    %cst_16 = arith.constant 0.000000e+00 : f32
    %26 = vector.broadcast %cst_16 : f32 to vector<8x128xf32>
    %27 = arith.subf %26, %25 : vector<8x128xf32>
    %28 = math.exp %27 : vector<8x128xf32>
    %29 = math.log1p %28 : vector<8x128xf32>
    %30 = arith.addf %24, %29 : vector<8x128xf32>
    %31 = arith.mulf %19, %20 : vector<8x128xf32>
    %32 = arith.subf %30, %31 : vector<8x128xf32>
    %cst_17 = arith.constant 0.000000e+00 : f32
    %33 = vector.broadcast %cst_17 : f32 to vector<8x128xf32>
    %34 = arith.cmpf ogt, %21, %33 : vector<8x128xf32>
    %cst_18 = arith.constant 0.000000e+00 : f32
    %35 = vector.broadcast %cst_18 : f32 to vector<8x128xf32>
    %36 = arith.select %34, %32, %35 : vector<8x128xi1>, vector<8x128xf32>
    %37 = arith.mulf %36, %21 : vector<8x128xf32>
    %38 = vector.shape_cast %37 : vector<8x128xf32> to vector<1x8x128xf32>
    %cst_19 = arith.constant dense<0.000000e+00> : vector<1xf32>
    %39 = vector.multi_reduction <add>, %38, %cst_19 [1, 2] : vector<1x8x128xf32> to vector<1xf32>
    %40 = vector.shape_cast %39 : vector<1xf32> to vector<1x1x1xf32>
    %41 = vector.extract %40[0, 0, 0] : f32 from vector<1x1x1xf32>
    %42 = arith.subf %19, %20 : vector<8x128xf32>
    %43 = math.absf %42 : vector<8x128xf32>
    %cst_20 = arith.constant 1.000000e+00 : f32
    %44 = vector.broadcast %cst_20 : f32 to vector<8x128xf32>
    %45 = arith.cmpf olt, %43, %44 : vector<8x128xf32>
    %cst_21 = arith.constant 5.000000e-01 : f32
    %46 = vector.broadcast %cst_21 : f32 to vector<8x128xf32>
    %47 = arith.mulf %46, %42 : vector<8x128xf32>
    %48 = arith.mulf %47, %42 : vector<8x128xf32>
    %cst_22 = arith.constant 5.000000e-01 : f32
    %49 = vector.broadcast %cst_22 : f32 to vector<8x128xf32>
    %50 = arith.subf %43, %49 : vector<8x128xf32>
    %51 = arith.select %45, %48, %50 : vector<8x128xi1>, vector<8x128xf32>
    %cst_23 = arith.constant 0.000000e+00 : f32
    %52 = vector.broadcast %cst_23 : f32 to vector<8x128xf32>
    %53 = arith.cmpf ogt, %22, %52 : vector<8x128xf32>
    %cst_24 = arith.constant 0.000000e+00 : f32
    %54 = vector.broadcast %cst_24 : f32 to vector<8x128xf32>
    %55 = arith.select %53, %51, %54 : vector<8x128xi1>, vector<8x128xf32>
    %56 = arith.mulf %55, %22 : vector<8x128xf32>
    %57 = vector.shape_cast %56 : vector<8x128xf32> to vector<1x8x128xf32>
    %cst_25 = arith.constant dense<0.000000e+00> : vector<1xf32>
    %58 = vector.multi_reduction <add>, %57, %cst_25 [1, 2] : vector<1x8x128xf32> to vector<1xf32>
    %59 = vector.shape_cast %58 : vector<1xf32> to vector<1x1x1xf32>
    %60 = vector.extract %59[0, 0, 0] : f32 from vector<1x1x1xf32>
    %61 = arith.addf %18, %41 : f32
    %c0_26 = arith.constant 0 : index
    %62 = memref.load %arg6[%c0_26] : memref<4xf32, #tpu.memory_space<smem>>
    memref.store %61, %arg6[%c0_26] : memref<4xf32, #tpu.memory_space<smem>>
    %c1 = arith.constant 1 : index
    %63 = memref.load %arg6[%c1] : memref<4xf32, #tpu.memory_space<smem>>
    memref.store %60, %arg6[%c1] : memref<4xf32, #tpu.memory_space<smem>>
    %cst_27 = arith.constant 1.000000e+00 : f32
    %64 = arith.mulf %cst_27, %60 : f32
    %65 = arith.addf %61, %64 : f32
    %c2 = arith.constant 2 : index
    %66 = memref.load %arg6[%c2] : memref<4xf32, #tpu.memory_space<smem>>
    memref.store %65, %arg6[%c2] : memref<4xf32, #tpu.memory_space<smem>>
    %c3 = arith.constant 3 : index
    %67 = memref.load %arg6[%c3] : memref<4xf32, #tpu.memory_space<smem>>
    memref.store %18, %arg6[%c3] : memref<4xf32, #tpu.memory_space<smem>>
    return
  }
}

</mosaic_0001>

<bundles_post_ra>
// kernel: squeeze.5
= control target key start
LH: loop header
LB: loop body
LE: loop exit
PB: predicated region body
PF: predicated region fallthrough
CT: control target
= control target key end

     0   :  { %s105_s12 = smov 36   ;;  %vm16_vm0 = vcmask 31744   ;;  %s106_s13 = smov 40   ;;  %vm22_vm1 = vcmask 392544   ;;  %vm28_vm2 = vcmask 359744   ;;  %vm34_vm3 = vcmask 326944   ;;  %s137_s0 = inlined_call_operand.vmem [shape: f32[1,3,4,4], index: 0, kind: input, shape index: {}]   ;;  %s138_s1 = inlined_call_operand.vmem [shape: f32[48], index: 1, kind: output, shape index: {}]  }
   0x1   :  { %v91_v0 = vld [vmem:[%s137_s0 + $0x8] sm:$0xf]  ;;  %v92_v1 = vld [vmem:[%s137_s0 + $0x4] sm:$0xf]  ;;  %v13_v2 = vld [vmem:[%s137_s0] sm:$0xf] }
   0x2   :  { %8 = vst [vmem:[#allocation1 + $0x10] sm:$0xf] %v91_v0  ;;  %12 = vst [vmem:[#allocation1 + $0x8] sm:$0xf] %v92_v1  ;;  %s104_s0 = smov 44   ;;  %s107_s14 = smov 32  }
   0x3   :  { %14 = vst [vmem:[#allocation1] sm:$0xf] %v13_v2  ;;  %s108_s15 = smov 28   ;;  %s109_s16 = smov 24   ;;  %vm40_vm4 = vcmask 294144   ;;  %vm46_vm5 = vcmask 261344  }
   0x4   :  { %s110_s17 = smov 20   ;;  %s111_s18 = smov 16   ;;  %vm52_vm6 = vcmask 228544   ;;  %vm58_vm7 = vcmask 195744   ;;  %vm64_vm8 = vcmask 162944   ;;  %vm70_vm9 = vcmask 130144  }
   0x5   :  { %s112_s19 = smov 12   ;;  %s113_s20 = smov 8   ;;  %vm76_vm10 = vcmask 97344   ;;  %vm82_vm11 = vcmask 64544  }
   0x6   :  { %s114_s21 = smov 4  }
   0x9   :  { %v19_v3 = vld [vmem:[#allocation1 + $0x13] sm:$0x1]   ;;  %v31_v4 = vld [vmem:[#allocation1 + $0x11] sm:$0x1]   ;;  %v25_v5 = vld [vmem:[#allocation1 + $0x12] sm:$0x1]  }
   0xa   :  { %20 = vrot.lane.b32.xlu0 %v19_v3, %s104_s0  ;;  %32 = vrot.lane.b32.xlu1 %v31_v4, %s105_s12  ;;  %v37_v6 = vld [vmem:[#allocation1 + $0x10] sm:$0x1]   ;;  %v15_v7 = vld [vmem:[#allocation1] sm:$0x1]   ;;  %v43_v8 = vld [vmem:[#allocation1 + $0xb] sm:$0x1]  }
   0xb   :  { %17 = vst.msk [vmem:[#allocation0] sm:$0x1] %vm16_vm0, %v15_v7   ;;  %v49_v9 = vld [vmem:[#allocation1 + $0xa] sm:$0x1]   ;;  %v55_v10 = vld [vmem:[#allocation1 + $0x9] sm:$0x1]  }
   0xc   :  { %v61_v11 = vld [vmem:[#allocation1 + $0x8] sm:$0x1]   ;;  %v67_v12 = vld [vmem:[#allocation1 + $0x3] sm:$0x1]   ;;  %v73_v13 = vld [vmem:[#allocation1 + $0x2] sm:$0x1]  }
   0xd   :  { %v79_v14 = vld [vmem:[#allocation1 + $0x1] sm:$0x1]  }
   0xe   :  { %26 = vrot.lane.b32.xlu0 %v25_v5, %s106_s13  ;;  %38 = vrot.lane.b32.xlu1 %v37_v6, %s107_s14 }
  0x12   :  { %44 = vrot.lane.b32.xlu0 %v43_v8, %s108_s15  ;;  %50 = vrot.lane.b32.xlu1 %v49_v9, %s109_s16 }
  0x16   :  { %56 = vrot.lane.b32.xlu0 %v55_v10, %s110_s17  ;;  %62 = vrot.lane.b32.xlu1 %v61_v11, %s111_s18 }
  0x1a   :  { %68 = vrot.lane.b32.xlu0 %v67_v12, %s112_s19  ;;  %74 = vrot.lane.b32.xlu1 %v73_v13, %s113_s20 }
  0x1e   :  { %80 = vrot.lane.b32.xlu0 %v79_v14, %s114_s21 }
  0x7c   :  { %v21_v15 = vpop.permute.xlu0 %20   ;;  %v33_v16 = vpop.permute.xlu1 %32  }
  0x7d   :  { %23 = vst.msk [vmem:[#allocation0] sm:$0x1] %vm22_vm1, %v21_v15  }
  0x80   :  { %v27_v17 = vpop.permute.xlu0 %26   ;;  %v39_v18 = vpop.permute.xlu1 %38  }
  0x81   :  { %29 = vst.msk [vmem:[#allocation0] sm:$0x1] %vm28_vm2, %v27_v17  }
  0x82   :  { %35 = vst.msk [vmem:[#allocation0] sm:$0x1] %vm34_vm3, %v33_v16  }
  0x83   :  { %41 = vst.msk [vmem:[#allocation0] sm:$0x1] %vm40_vm4, %v39_v18  }
  0x84   :  { %v45_v19 = vpop.permute.xlu0 %44   ;;  %v51_v20 = vpop.permute.xlu1 %50  }
  0x85   :  { %47 = vst.msk [vmem:[#allocation0] sm:$0x1] %vm46_vm5, %v45_v19  }
  0x86   :  { %53 = vst.msk [vmem:[#allocation0] sm:$0x1] %vm52_vm6, %v51_v20  }
  0x88   :  { %v57_v21 = vpop.permute.xlu0 %56   ;;  %v63_v22 = vpop.permute.xlu1 %62  }
  0x89   :  { %59 = vst.msk [vmem:[#allocation0] sm:$0x1] %vm58_vm7, %v57_v21  }
  0x8a   :  { %65 = vst.msk [vmem:[#allocation0] sm:$0x1] %vm64_vm8, %v63_v22  }
  0x8c   :  { %v69_v23 = vpop.permute.xlu0 %68   ;;  %v75_v24 = vpop.permute.xlu1 %74  }
  0x8d   :  { %71 = vst.msk [vmem:[#allocation0] sm:$0x1] %vm70_vm9, %v69_v23  }
  0x8e   :  { %77 = vst.msk [vmem:[#allocation0] sm:$0x1] %vm76_vm10, %v75_v24  }
  0x90   :  { %v81_v25 = vpop.permute.xlu0 %80  }
  0x91   :  { %83 = vst.msk [vmem:[#allocation0] sm:$0x1] %vm82_vm11, %v81_v25  }
  0x98   :  { %v87_v26 = vld [vmem:[#allocation0] sm:$0x1] }
  0x99   :  { %89 = vst [vmem:[%s138_s1] sm:$0x1] %v87_v26 }

// kernel: squeeze.4
= control target key start
LH: loop header
LB: loop body
LE: loop exit
PB: predicated region body
PF: predicated region fallthrough
CT: control target
= control target key end

     0   :  { %s139_s10 = smov 120   ;;  %s140_s11 = smov 104   ;;  %vm4_vm0 = vcmask 64512   ;;  %vm10_vm1 = vcmask 1048512   ;;  %vm16_vm2 = vcmask 982912   ;;  %vm22_vm3 = vcmask 917312   ;;  %s215_s0 = inlined_call_operand.vmem [shape: f32[1,3,8,8], index: 0, kind: input, shape index: {}]   ;;  %s216_s1 = inlined_call_operand.vmem [shape: f32[192], index: 1, kind: output, shape index: {}]  }
   0x1   :  { %v109_v0 = vld [vmem:[%s215_s0 + $0xf] sm:$0x1]   ;;  %v111_v1 = vld [vmem:[%s215_s0 + $0xd] sm:$0x1]   ;;  %v110_v2 = vld [vmem:[%s215_s0 + $0xe] sm:$0x1]  }
   0x2   :  { %8 = vrot.lane.b32.xlu0 %v109_v0, %s139_s10  ;;  %20 = vrot.lane.b32.xlu1 %v111_v1, %s140_s11  ;;  %v112_v3 = vld [vmem:[%s215_s0 + $0xc] sm:$0x1]   ;;  %s141_s16 = smov 112   ;;  %s142_s17 = smov 96   ;;  %v113_v4 = vld [vmem:[%s215_s0 + $0xb] sm:$0x1]  }
   0x3   :  { %v114_v5 = vld [vmem:[%s215_s0 + $0xa] sm:$0x1]   ;;  %s143_s22 = smov 88   ;;  %s144_s23 = smov 80   ;;  %v115_v6 = vld [vmem:[%s215_s0 + $0x9] sm:$0x1]  }
   0x4   :  { %v116_v7 = vld [vmem:[%s215_s0 + $0x8] sm:$0x1]   ;;  %s55_s28 = smov 3  ;;  %s62_s29 = smov 3  ;;  %vm28_vm4 = vcmask 851712   ;;  %vm34_vm5 = vcmask 786112  }
   0x5   :  { %s2_s30 = smov 3  ;;  %s145_s4 = smov 72   ;;  %v117_v9 = vld [vmem:[%s215_s0 + $0x7] ss:$16 sm:%s55_s28]   ;;  %v118_v10 = vld [vmem:[%s215_s0 + $0x6] ss:$16 sm:%s62_s29]  }
   0x6   :  { %14 = vrot.lane.b32.xlu0 %v110_v2, %s141_s16  ;;  %26 = vrot.lane.b32.xlu1 %v112_v3, %s142_s17  ;;  %v3_v8 = vld [vmem:[%s215_s0] ss:$16 sm:%s2_s30]   ;;  %s146_s5 = smov 64   ;;  %s69_s10 = smov 3  ;;  %vm40_vm6 = vcmask 720512   ;;  %vm46_vm7 = vcmask 654912  }
   0x7   :  { %5 = vst.msk [vmem:[#allocation0] sm:$0x3] %vm4_vm0, %v3_v8   ;;  %s76_s11 = smov 3  ;;  %s147_s12 = smov 56   ;;  %v119_v11 = vld [vmem:[%s215_s0 + $0x5] ss:$16 sm:%s69_s10]  }
   0x8   :  { %s148_s13 = smov 48   ;;  %v120_v12 = vld [vmem:[%s215_s0 + $0x4] ss:$16 sm:%s76_s11]   ;;  %s83_s18 = smov 3  ;;  %vm52_vm8 = vcmask 589312   ;;  %vm59_vm9 = vcmask 523712  }
   0x9   :  { %s90_s19 = smov 3  ;;  %s149_s20 = smov 40   ;;  %v121_v13 = vld [vmem:[%s215_s0 + $0x3] ss:$16 sm:%s83_s18]   ;;  %vm66_vm10 = vcmask 458112   ;;  %vm73_vm11 = vcmask 392512  }
   0xa   :  { %32 = vrot.lane.b32.xlu0 %v113_v4, %s143_s22  ;;  %38 = vrot.lane.b32.xlu1 %v114_v5, %s144_s23  ;;  %s150_s21 = smov 32   ;;  %v122_v14 = vld [vmem:[%s215_s0 + $0x2] ss:$16 sm:%s90_s19]   ;;  %s97_s26 = smov 3  ;;  %vm80_vm12 = vcmask 326912   ;;  %vm87_vm13 = vcmask 261312  }
   0xb   :  { %s151_s27 = smov 24   ;;  %s152_s28 = smov 16   ;;  %v123_v15 = vld [vmem:[%s215_s0 + $0x1] ss:$16 sm:%s97_s26]   ;;  %vm94_vm14 = vcmask 195712   ;;  %vm101_vm15 = vcmask 130112  }
   0xc   :  { %s153_s0 = smov 8  }
   0xe   :  { %44 = vrot.lane.b32.xlu0 %v115_v6, %s145_s4  ;;  %50 = vrot.lane.b32.xlu1 %v116_v7, %s146_s5 }
  0x12   :  { %57 = vrot.lane.b32.xlu0 %v117_v9, %s147_s12  ;;  %64 = vrot.lane.b32.xlu1 %v118_v10, %s148_s13 }
  0x16   :  { %71 = vrot.lane.b32.xlu0 %v119_v11, %s149_s20  ;;  %78 = vrot.lane.b32.xlu1 %v120_v12, %s150_s21 }
  0x1a   :  { %85 = vrot.lane.b32.xlu0 %v121_v13, %s151_s27  ;;  %92 = vrot.lane.b32.xlu1 %v122_v14, %s152_s28 }
  0x1e   :  { %99 = vrot.lane.b32.xlu0 %v123_v15, %s153_s0 }
  0x74   :  { %v9_v16 = vpop.permute.xlu0 %8   ;;  %v21_v17 = vpop.permute.xlu1 %20  }
  0x75   :  { %11 = vst.msk [vmem:[#allocation0] sm:$0x1] %vm10_vm1, %v9_v16  }
  0x78   :  { %v15_v18 = vpop.permute.xlu0 %14   ;;  %v27_v19 = vpop.permute.xlu1 %26  }
  0x79   :  { %17 = vst.msk [vmem:[#allocation0] sm:$0x1] %vm16_vm2, %v15_v18  }
  0x7a   :  { %23 = vst.msk [vmem:[#allocation0] sm:$0x1] %vm22_vm3, %v21_v17  }
  0x7b   :  { %29 = vst.msk [vmem:[#allocation0] sm:$0x1] %vm28_vm4, %v27_v19  }
  0x7c   :  { %v33_v20 = vpop.permute.xlu0 %32   ;;  %v39_v21 = vpop.permute.xlu1 %38  }
  0x7d   :  { %35 = vst.msk [vmem:[#allocation0] sm:$0x1] %vm34_vm5, %v33_v20  }
  0x7e   :  { %41 = vst.msk [vmem:[#allocation0] sm:$0x1] %vm40_vm6, %v39_v21  }
  0x80   :  { %v45_v22 = vpop.permute.xlu0 %44   ;;  %v51_v23 = vpop.permute.xlu1 %50  }
  0x81   :  { %47 = vst.msk [vmem:[#allocation0] sm:$0x1] %vm46_vm7, %v45_v22  }
  0x82   :  { %53 = vst.msk [vmem:[#allocation0] sm:$0x1] %vm52_vm8, %v51_v23  }
  0x84   :  { %v58_v24 = vpop.permute.xlu0 %57   ;;  %v65_v25 = vpop.permute.xlu1 %64  }
  0x85   :  { %60 = vst.msk [vmem:[#allocation0] sm:$0x3] %vm59_vm9, %v58_v24  }
  0x86   :  { %67 = vst.msk [vmem:[#allocation0] sm:$0x3] %vm66_vm10, %v65_v25  }
  0x88   :  { %v72_v26 = vpop.permute.xlu0 %71   ;;  %v79_v27 = vpop.permute.xlu1 %78  }
  0x89   :  { %74 = vst.msk [vmem:[#allocation0] sm:$0x3] %vm73_vm11, %v72_v26  }
  0x8a   :  { %81 = vst.msk [vmem:[#allocation0] sm:$0x3] %vm80_vm12, %v79_v27  }
  0x8c   :  { %v86_v28 = vpop.permute.xlu0 %85   ;;  %v93_v29 = vpop.permute.xlu1 %92  }
  0x8d   :  { %88 = vst.msk [vmem:[#allocation0] sm:$0x3] %vm87_vm13, %v86_v28  }
  0x8e   :  { %95 = vst.msk [vmem:[#allocation0] sm:$0x3] %vm94_vm14, %v93_v29  }
  0x90   :  { %v100_v30 = vpop.permute.xlu0 %99  }
  0x91   :  { %102 = vst.msk [vmem:[#allocation0] sm:$0x3] %vm101_vm15, %v100_v30  }
  0x98   :  { %v106_v31 = vld [vmem:[#allocation0] sm:$0x3] }
  0x99   :  { %108 = vst [vmem:[%s216_s1] sm:$0x3] %v106_v31 }

// kernel: squeeze.7
= control target key start
LH: loop header
LB: loop body
LE: loop exit
PB: predicated region body
PF: predicated region fallthrough
CT: control target
= control target key end

     0   :  { %vm42_vm0 = vcmask 1039360   ;;  %s152_s0 = inlined_call_operand.vmem [shape: f32[1,255,4,4], index: 0, kind: input, shape index: {}]   ;;  %s153_s1 = inlined_call_operand.vmem [shape: f32[255,16], index: 1, kind: output, shape index: {}]  }
   0x1   :  { %v80_v0 = vld [vmem:[%s152_s0 + $0x1c] sm:$0xf]  ;;  %v81_v1 = vld [vmem:[%s152_s0 + $0x18] sm:$0xf]  ;;  %v82_v2 = vld [vmem:[%s152_s0 + $0x14] sm:$0xf] }
   0x2   :  { %8 = vst [vmem:[#allocation0 + $0x38] sm:$0xf] %v80_v0  ;;  %13 = vst [vmem:[#allocation0 + $0x30] sm:$0xf] %v81_v1  ;;  %v83_v3 = vld [vmem:[%s152_s0 + $0x10] sm:$0xf] }
   0x3   :  { %18 = vst [vmem:[#allocation0 + $0x28] sm:$0xf] %v82_v2  ;;  %v84_v4 = vld [vmem:[%s152_s0 + $0xc] sm:$0xf]  ;;  %v85_v5 = vld [vmem:[%s152_s0 + $0x8] sm:$0xf] }
   0x4   :  { %23 = vst [vmem:[#allocation0 + $0x20] sm:$0xf] %v83_v3  ;;  %28 = vst [vmem:[#allocation0 + $0x18] sm:$0xf] %v84_v4  ;;  %v86_v6 = vld [vmem:[%s152_s0 + $0x4] sm:$0xf] }
   0x5   :  { %33 = vst [vmem:[#allocation0 + $0x10] sm:$0xf] %v85_v5  ;;  %v38_v7 = vld [vmem:[%s152_s0] sm:$0xf]  ;;  %37 = vst [vmem:[#allocation0 + $0x8] sm:$0xf] %v86_v6 }
   0x6   :  { %39 = vst [vmem:[#allocation0] sm:$0xf] %v38_v7 }
   0x9   :  { %v56_v9 = vld [vmem:[#allocation0 + $0x38] sm:$0xf]   ;;  %v71_v10 = vld [vmem:[#allocation0 + $0x30] sm:$0xf]  }
   0xa   :  { %v51_v8 = vld [vmem:[#allocation0 + $0x28] sm:$0xf]   ;;  %90 = vst.msk [vmem:[%s153_s1 + $0x1c] sm:$0xf] %vm42_vm0, %v56_v9   ;;  %93 = vst [vmem:[%s153_s1 + $0x14] sm:$0xf] %v71_v10  }
   0xb   :  { %v46_v11 = vld [vmem:[#allocation0 + $0x18] sm:$0xf]   ;;  %89 = vst.msk [vmem:[%s153_s1 + $0x18] sm:$0xf] %vm42_vm0, %v51_v8   ;;  %v67_v13 = vld [vmem:[#allocation0 + $0x20] sm:$0xf]  }
   0xc   :  { %v63_v12 = vld [vmem:[#allocation0 + $0x10] sm:$0xf]   ;;  %v41_v14 = vld [vmem:[#allocation0 + $0x8] sm:$0xf]   ;;  %88 = vst.msk [vmem:[%s153_s1 + $0xc] sm:$0xf] %vm42_vm0, %v46_v11  }
   0xd   :  { %v60_v15 = vld [vmem:[#allocation0] sm:$0xf]   ;;  %91 = vst [vmem:[%s153_s1 + $0x4] sm:$0xf] %v63_v12   ;;  %92 = vst [vmem:[%s153_s1 + $0x10] sm:$0xf] %v67_v13  }
   0xe   :  { %87 = vst.msk [vmem:[%s153_s1 + $0x8] sm:$0xf] %vm42_vm0, %v41_v14   ;;  %61 = vst [vmem:[%s153_s1] sm:$0xf] %v60_v15  }

// kernel: _device_loss.1
= control target key start
LH: loop header
LB: loop body
LE: loop exit
PB: predicated region body
PF: predicated region fallthrough
CT: control target
= control target key end

     0   :  { %s224_s0 = inlined_call_operand.vmem [shape: f32[2,128], index: 0, kind: input, shape index: {}]   ;;  %s225_s1 = inlined_call_operand.vmem [shape: f32[2,128], index: 1, kind: input, shape index: {}]   ;;  %s226_s2 = inlined_call_operand.vmem [shape: f32[8,128], index: 2, kind: input, shape index: {}]   ;;  %s227_s3 = inlined_call_operand.vmem [shape: f32[8,128], index: 3, kind: input, shape index: {}]   ;;  %s228_s4 = inlined_call_operand.vmem [shape: f32[8,128], index: 4, kind: input, shape index: {}]   ;;  %s229_s5 = inlined_call_operand.vmem [shape: f32[8,128], index: 5, kind: input, shape index: {}]   ;;  %s230_s6 = inlined_call_operand.hbm [shape: f32[4], index: 6, kind: output, shape index: {}]  }
   0x1   :  { %v55_v0 = vld [vmem:[%s226_s2] sm:$0xff] }
   0x2   :  { %v56_v1 = vld [vmem:[%s227_s3] sm:$0xff]  ;;  %v60_v4 = vand.u32 2147483647, %v55_v0 }
   0x3   :  { %v58_v2 = vld [vmem:[%s229_s5] sm:$0xff]  ;;  %v88_v3 = vsub.f32 %v55_v0, %v56_v1 }
   0x4   :  { %v24_v5 = vld [vmem:[%s224_s0] sm:$0x3] }
   0x5   :  { %v25_v6 = vld [vmem:[%s225_s1] sm:$0x3] }
   0x6   :  { %11 = vsyncpa [#allocation3], 0  ;;  %v89_v7 = vand.u32 2147483647, %v88_v3  ;;  %v91_v8 = vmul.f32 0.5, %v88_v3  ;;  %v61_v9 = vsub.f32 0.0, %v60_v4  ;;  %v74_v35 = vmul.f32 %v56_v1, %v55_v0 }
   0x7   :  { %vm26_vm0 = vcmp.gt.f32.partialorder %v25_v6, 0.0  ;;  %vm95_vm1 = vcmp.gt.f32.partialorder %v58_v2, 0.0  ;;  %v59_v31 = vmax.f32 %v55_v0, 0.0  ;;  %v57_v40 = vld [vmem:[%s228_s4] sm:$0xff]  ;;  %vm44_vm6 = vcmask 1041408   ;;  %s146_s10 = scalar_lea.hbm %s230_s6, 16 }
   0x8   :  { %v27_v10 = vsel %vm26_vm0, %v24_v5, 0.0  ;;  %vm90_vm2 = vcmp.lt.f32.partialorder %v89_v7, 1.0  ;;  %v92_v11 = vmul.f32 %v91_v8, %v88_v3  ;;  %v130_v12 = vadd.f32 -0.5, %v89_v7  ;;  %p147_p0 = scmp.ne.s32.totalorder %s230_s6, %s146_s10  ;;  %p150_p1 = scmp.lt.u32.totalorder %s146_s10, %s230_s6 }
   0x9   :  { %v62_v13 = vmul.f32 1.442695, %v61_v9  ;;  %v29_v14 = vand.u32 2147483647, %v27_v10  ;;  %v28_v39 = vmax.f32 %v27_v10, 0.0  ;;  %vm76_vm5 = vcmp.gt.f32.partialorder %v57_v40, 0.0 }
   0xa   :  { %v94_v15 = vsel %vm90_vm2, %v92_v11, %v130_v12  ;;  %p152_p2 = pnand %p150_p1, %p147_p0 }
   0xb   :  { %138 = vpow2.f32 %v62_v13  ;;  %v96_v16 = vsel %vm95_vm1, %v94_v15, 0.0  ;;  %v30_v17 = vsub.f32 0.0, %v29_v14 }
   0xc   :  { %v97_v18 = vmul.f32 %v96_v16, %v58_v2 }
   0xd   :  { %v31_v19 = vmul.f32 1.442695, %v30_v17 }
   0xe   :  { %98 = vadd.xlane.f32.xlu1 %v97_v18 }
   0xf   :  { %140 = vpow2.f32 %v31_v19 }
  0x15   :  { %v139_v20 = vpop.eup %138 }
  0x16   :  { %v64_v21 = vadd.f32 1.0, %v139_v20  ;;  %v67_v22 = vmul.f32 -0.5, %v139_v20  ;;  %v70_v27 = vand.u32 2147483647, %v139_v20 }
  0x18   :  { %142 = vlog2.f32 %v64_v21  ;;  %v68_v25 = vadd.f32 1.0, %v67_v22  ;;  %vm71_vm3 = vcmp.lt.f32.partialorder %v70_v27, 0.0004427343 }
  0x19   :  { %v141_v23 = vpop.eup %140 }
  0x1a   :  { %v33_v24 = vadd.f32 1.0, %v141_v23  ;;  %v36_v26 = vmul.f32 -0.5, %v141_v23  ;;  %v69_v28 = vmul.f32 %v139_v20, %v68_v25  ;;  %v39_v32 = vand.u32 2147483647, %v141_v23 }
  0x1c   :  { %144 = vlog2.f32 %v33_v24  ;;  %v37_v30 = vadd.f32 1.0, %v36_v26  ;;  %vm40_vm4 = vcmp.lt.f32.partialorder %v39_v32, 0.0004427343 }
  0x1e   :  { %v38_v36 = vmul.f32 %v141_v23, %v37_v30 }
  0x22   :  { %v143_v29 = vpop.eup %142 }
  0x23   :  { %v66_v33 = vmul.f32 0.6931472, %v143_v29 }
  0x25   :  { %v72_v34 = vsel %vm71_vm3, %v69_v28, %v66_v33 }
  0x26   :  { %v73_v37 = vadd.f32 %v72_v34, %v59_v31  ;;  %v145_v38 = vpop.eup %144 }
  0x27   :  { %v35_v41 = vmul.f32 0.6931472, %v145_v38 }
  0x28   :  { %v75_v42 = vsub.f32 %v73_v37, %v74_v35 }
  0x29   :  { %v41_v43 = vsel %vm40_vm4, %v38_v36, %v35_v41 }
  0x2a   :  { %v42_v44 = vadd.f32 %v41_v43, %v28_v39  ;;  %v77_v46 = vsel %vm76_vm5, %v75_v42, 0.0 }
  0x2b   :  { %v78_v48 = vmul.f32 %v77_v46, %v57_v40 }
  0x2c   :  { %v43_v45 = vmul.f32 %v42_v44, %v25_v6 }
  0x2e   :  { %v45_v47 = vsel %vm44_vm6, %v43_v45, 0.0 }
  0x2f   :  { %46 = vadd.xlane.f32.xlu0 %v45_v47 }
  0x33   :  { %79 = vadd.xlane.f32.xlu0 %v78_v48 }
  0x9b   :  { %v99_v49 = vpop.xlane.xlu1 %98 }
  0x9c   :  { %v100_v50 = vrot.slane %v99_v49, 4 }
  0x9e   :  { %v101_v51 = vadd.f32 %v100_v50, %v99_v49 }
  0xa0   :  { %v102_v55 = vrot.slane %v101_v51, 2 }
  0xa2   :  { %v103_v61 = vadd.f32 %v102_v55, %v101_v51 }
  0xa4   :  { %v104_v2 = vrot.slane %v103_v61, 1 }
  0xa6   :  { %v105_v5 = vadd.f32 %v104_v2, %v103_v61 }
  0xbc   :  { %v47_v52 = vpop.xlane.xlu0 %46 }
  0xbd   :  { %v48_v53 = vrot.slane %v47_v52, 4 }
  0xbf   :  { %v49_v54 = vadd.f32 %v48_v53, %v47_v52 }
  0xc0   :  { %v80_v56 = vpop.xlane.xlu0 %79 }
  0xc1   :  { %v50_v57 = vrot.slane %v49_v54, 2  ;;  %v81_v58 = vrot.slane %v80_v56, 4 }
  0xc3   :  { %v82_v59 = vadd.f32 %v81_v58, %v80_v56  ;;  %v51_v60 = vadd.f32 %v50_v57, %v49_v54 }
  0xc5   :  { %v83_v62 = vrot.slane %v82_v59, 2  ;;  %v52_v63 = vrot.slane %v51_v60, 1 }
  0xc7   :  { %v84_v0 = vadd.f32 %v83_v62, %v82_v59  ;;  %v53_v1 = vadd.f32 %v52_v63, %v51_v60 }
  0xc9   :  { %131 = vpush %v53_v1  ;;  %v85_v3 = vrot.slane %v84_v0, 1 }
  0xcb   :  { %v86_v4 = vadd.f32 %v85_v3, %v84_v0 }
  0xcd   :  { %133 = vpush %v86_v4 }
  0xce   :  { %135 = vpush %v105_v5 }
  0xfa   :  { %s132_s2 = spop %131 }
  0xfb   :  { %116 = sst [smem:[#allocation2 + $0x3]] %s132_s2 }
  0xfe   :  { %s134_s3 = spop %133 }
  0xff   :  { %s107_s4 = sadd.f32 %s134_s3, %s132_s2  ;;  %s136_s5 = spop %135 }
 0x100   :  { %111 = sst [smem:[#allocation2 + $0x1]] %s136_s5 }
 0x101   :  { %109 = sst [smem:[#allocation2]] %s107_s4 }
 0x102   :  { %s112_s7 = sadd.f32 %s136_s5, %s107_s4 }
 0x104   :  { %114 = sst [smem:[#allocation2 + $0x2]] %s112_s7 }
 0x105   :  { %155 = shalt.err (!%p152_p2)
}
 0x106   :  { %s158_s15 = smov [#allocation2]  }
 0x107   :  { %124 = dma.smem_to_hbm %s158_s15, 16, %s230_s6, [#allocation3]  }
 0x108   :  { %156 = dma.done.wait [#allocation3], 16  }
 0x109   :  { %157 = vsyncadd [#allocation3], 4294967280 }
 0x10a   :  { %128 = sfence }
 0x10b   :  { %129 = vsyncpa [#allocation3], 1 }

</bundles_post_ra>
